<compile_context>
chip_gen: v7x
topology: tpu7x:2x2x1
jax: 0.10.0
libtpu: 0.0.40
codegen_flags: <defaults>
</compile_context>

<pallas_src>
import functools
import math

import jax
import jax.numpy as jnp
import numpy as np
from jax.experimental import pallas as pl
from jax.experimental.pallas import tpu as pltpu


def _rpb_kernel(coords_ref, wb1_ref, w2_ref, onehot_ref, out_ref):
    # ---- cpb_mlp, computed transposed (head axis on sublanes, coords on lanes)
    w1 = wb1_ref[:, 0:1]                                      # (D, 1)
    b1 = wb1_ref[:, 1:2]                                      # (D, 1)
    # hidden_T[d, l] = relu(w1[d] * coords[l] + b1[d])          (D, Lp)
    hidden = jnp.maximum(w1 * coords_ref[...] + b1, 0.0)
    # table_T[h, l] = sum_d w2[h, d] * hidden_T[d, l]            (Hp, Lp)
    table = jnp.dot(w2_ref[...], hidden,
                    preferred_element_type=jnp.float32,
                    precision=jax.lax.Precision.HIGHEST)

    # ---- hoisted activation: the gather/repeat_interleave only permutes
    # entries, so 16*sigmoid commutes with it -> Hp*Lp transcendentals only.
    table = 16.0 * jax.nn.sigmoid(table)                      # (Hp, Lp)

    # ---- gather + repeat_interleave as a single one-hot matmul on the MXU.
    # onehot is a host-built constant with zero padded rows, so padded coord
    # lanes never contribute.  out[h, m] = table_T[h, rel(m)].
    out_ref[...] = jnp.dot(table, onehot_ref[...],
                           preferred_element_type=jnp.float32,
                           precision=jax.lax.Precision.HIGHEST)  # (Hp, NN)


def _round_up(x: int, m: int) -> int:
    return ((x + m - 1) // m) * m


def dynamic_relative_position_bias_1d(coords, w1, b1, w2, *,
                                      window_size: int, num_points: int):
    """coords: (L,1); w1: (1,D); b1: (1,D); w2: (D,H)  (same layouts as reference)."""
    L = coords.shape[0]
    D = w1.shape[1]
    H = w2.shape[1]
    N = window_size * num_points
    NN = N * N
    assert L == 2 * window_size - 1

    Lp = _round_up(L, 8)   # align gather-matmul K operand to the f32 sublane tile
    Hp = _round_up(H, 8)   # unmasked full-vreg output stores (v5e single vst slot)

    # ---- host-side constant: gather + repeat_interleave as a (Lp, NN) one-hot.
    c = np.arange(window_size)
    idx = c[:, None] - c[None, :] + (window_size - 1)                 # (W, W)
    idx = np.repeat(np.repeat(idx, num_points, axis=0),
                    num_points, axis=1).reshape(-1)                   # (NN,)
    onehot_np = np.zeros((Lp, NN), dtype=np.float32)
    onehot_np[idx, np.arange(NN)] = 1.0                               # padded rows stay 0
    onehot = jnp.asarray(onehot_np)

    # ---- wrapper-side layout plumbing (tiny arrays): lane-major padded coords,
    # packed (w1|b1), PyTorch-style (out, in) second-layer weight padded on heads.
    coords_row = jnp.zeros((1, Lp), jnp.float32).at[0, :L].set(coords.reshape(L))
    wb1 = jnp.concatenate([w1.reshape(D, 1), b1.reshape(D, 1)], axis=1)   # (D, 2)
    w2_t = jnp.zeros((Hp, D), jnp.float32).at[:H, :].set(w2.T)            # (Hp, D)

    out_flat = pl.pallas_call(
        _rpb_kernel,
        out_shape=jax.ShapeDtypeStruct((Hp, NN), jnp.float32),
        grid=(1,),
        in_specs=[
            pl.BlockSpec((1, Lp), lambda i: (0, 0)),
            pl.BlockSpec((D, 2), lambda i: (0, 0)),
            pl.BlockSpec((Hp, D), lambda i: (0, 0)),
            pl.BlockSpec((Lp, NN), lambda i: (0, 0)),
        ],
        out_specs=pl.BlockSpec((Hp, NN), lambda i: (0, 0)),
        compiler_params=pltpu.CompilerParams(
            dimension_semantics=("arbitrary",)),
    )(coords_row, wb1, w2_t, onehot)

    # Lane-dense (Hp, NN) slab -> (H, N, N); pure layout plumbing on the host.
    return out_flat[:H].reshape(H, N, N)


def make_relative_coords_table_1d(window_size: int,
                                  pretrained_window_size: int = 0):
    """Mirrors create_relative_coords_table_1d (a registered buffer in __init__)."""
    rc = jnp.arange(-(window_size - 1), window_size, dtype=jnp.float32)
    if pretrained_window_size > 0:
        rc = rc / (pretrained_window_size - 1)
    else:
        rc = rc / (window_size - 1)
    rc = rc * 8.0
    rc = jnp.sign(rc) * jnp.log2(jnp.abs(rc) + 1.0) / math.log2(8.0)
    return rc.reshape(-1, 1)  # (2W-1, 1)


def reference_forward(coords, w1, b1, w2, *, window_size: int, num_points: int):
    """Pure-JAX reference reproducing the PyTorch forward exactly (f32 dots)."""
    hi = jax.lax.Precision.HIGHEST
    hidden = jnp.maximum(jnp.dot(coords, w1, precision=hi) + b1, 0.0)
    table = jnp.dot(hidden, w2, precision=hi)                  # (2W-1, H)
    c = jnp.arange(window_size)
    idx = c[:, None] - c[None, :] + (window_size - 1)          # (W, W)
    bias = table[idx.reshape(-1)].reshape(window_size, window_size, -1)
    bias = jnp.repeat(bias, num_points, axis=0)
    bias = jnp.repeat(bias, num_points, axis=1)
    bias = jnp.transpose(bias, (2, 0, 1))
    return 16.0 * jax.nn.sigmoid(bias)


if __name__ == "__main__":
    # Small shapes consistent with the module.
    num_heads = 4
    window_size = 8
    mlp_dim = 32
    num_points = 4
    L = 2 * window_size - 1

    key = jax.random.PRNGKey(0)
    k1, k2, k3 = jax.random.split(key, 3)

    # Deterministic parameter init (PyTorch Linear-style uniform bounds).
    bound1 = 1.0 / math.sqrt(1.0)        # fan_in = 1
    bound2 = 1.0 / math.sqrt(mlp_dim)    # fan_in = mlp_dim
    w1 = jax.random.uniform(k1, (1, mlp_dim), jnp.float32, -bound1, bound1)
    b1 = jax.random.uniform(k2, (1, mlp_dim), jnp.float32, -bound1, bound1)
    w2 = jax.random.uniform(k3, (mlp_dim, num_heads), jnp.float32, -bound2, bound2)

    coords = make_relative_coords_table_1d(window_size)  # (L, 1)

    out = dynamic_relative_position_bias_1d(
        coords, w1, b1, w2, window_size=window_size, num_points=num_points)
    out = jax.block_until_ready(out)

    ref = reference_forward(coords, w1, b1, w2,
                            window_size=window_size, num_points=num_points)

    assert out.shape == (num_heads,
                         window_size * num_points,
                         window_size * num_points), out.shape
    np.testing.assert_allclose(np.asarray(out), np.asarray(ref),
                               rtol=1e-4, atol=1e-4)
    print("KERNEL_OK")
</pallas_src>

<mosaic_0001>
module attributes {stable_mosaic.version = 11 : i64} {
  func.func @_rpb_kernel(%arg0: i32, %arg1: memref<1x16xf32, #tpu.memory_space<vmem>>, %arg2: memref<32x2xf32, #tpu.memory_space<vmem>>, %arg3: memref<8x32xf32, #tpu.memory_space<vmem>>, %arg4: memref<16x1024xf32, #tpu.memory_space<vmem>>, %arg5: memref<8x1024xf32, #tpu.memory_space<vmem>>) attributes {dimension_semantics = [#tpu.dimension_semantics<arbitrary>], iteration_bounds = array<i64: 1>, scalar_prefetch = 0 : i64, scratch_operands = 0 : i64, tpu.core_type = #tpu.core_type<tc>, window_params = [{pipeline_mode = #tpu.pipeline_mode<synchronous>, transform_indices = @transform_0, window_bounds = array<i64: 1, 16>}, {pipeline_mode = #tpu.pipeline_mode<synchronous>, transform_indices = @transform_1, window_bounds = array<i64: 32, 2>}, {pipeline_mode = #tpu.pipeline_mode<synchronous>, transform_indices = @transform_2, window_bounds = array<i64: 8, 32>}, {pipeline_mode = #tpu.pipeline_mode<synchronous>, transform_indices = @transform_3, window_bounds = array<i64: 16, 1024>}, {pipeline_mode = #tpu.pipeline_mode<synchronous>, transform_indices = @transform_4, window_bounds = array<i64: 8, 1024>}]} {
    %c0 = arith.constant 0 : index
    %c0_0 = arith.constant 0 : index
    %0 = vector.load %arg2[%c0, %c0_0] : memref<32x2xf32, #tpu.memory_space<vmem>>, vector<32x1xf32>
    %c0_1 = arith.constant 0 : index
    %c1 = arith.constant 1 : index
    %1 = vector.load %arg2[%c0_1, %c1] : memref<32x2xf32, #tpu.memory_space<vmem>>, vector<32x1xf32>
    %c0_2 = arith.constant 0 : index
    %c0_3 = arith.constant 0 : index
    %2 = vector.load %arg1[%c0_2, %c0_3] : memref<1x16xf32, #tpu.memory_space<vmem>>, vector<1x16xf32>
    %3 = vector.broadcast %0 : vector<32x1xf32> to vector<32x16xf32>
    %4 = vector.broadcast %2 : vector<1x16xf32> to vector<32x16xf32>
    %5 = arith.mulf %3, %4 : vector<32x16xf32>
    %6 = vector.broadcast %1 : vector<32x1xf32> to vector<32x16xf32>
    %7 = arith.addf %5, %6 : vector<32x16xf32>
    %cst = arith.constant 0.000000e+00 : f32
    %8 = vector.broadcast %cst : f32 to vector<32x16xf32>
    %9 = arith.maximumf %7, %8 : vector<32x16xf32>
    %c0_4 = arith.constant 0 : index
    %c0_5 = arith.constant 0 : index
    %10 = vector.load %arg3[%c0_4, %c0_5] : memref<8x32xf32, #tpu.memory_space<vmem>>, vector<8x32xf32>
    %cst_6 = arith.constant dense<0.000000e+00> : vector<8x16xf32>
    %11 = tpu.matmul %10, %9, %cst_6 {dimension_numbers = #tpu.dot_dimension_numbers<[1], [0], [0], [1], [0, 0, 1, 1], [], []>, precision = #tpu.contract_precision<fp32>} : vector<8x32xf32>, vector<32x16xf32>, vector<8x16xf32> -> vector<8x16xf32>
    %12 = arith.negf %11 : vector<8x16xf32>
    %13 = math.exp %12 : vector<8x16xf32>
    %cst_7 = arith.constant 1.000000e+00 : f32
    %14 = vector.broadcast %cst_7 : f32 to vector<8x16xf32>
    %15 = arith.addf %14, %13 : vector<8x16xf32>
    %16 = arith.divf %14, %15 : vector<8x16xf32>
    %cst_8 = arith.constant 1.600000e+01 : f32
    %17 = vector.broadcast %cst_8 : f32 to vector<8x16xf32>
    %18 = arith.mulf %17, %16 : vector<8x16xf32>
    %c0_9 = arith.constant 0 : index
    %c0_10 = arith.constant 0 : index
    %19 = vector.load %arg4[%c0_9, %c0_10] : memref<16x1024xf32, #tpu.memory_space<vmem>>, vector<16x1024xf32>
    %cst_11 = arith.constant dense<0.000000e+00> : vector<8x1024xf32>
    %20 = tpu.matmul %18, %19, %cst_11 {dimension_numbers = #tpu.dot_dimension_numbers<[1], [0], [0], [1], [0, 0, 1, 1], [], []>, precision = #tpu.contract_precision<fp32>} : vector<8x16xf32>, vector<16x1024xf32>, vector<8x1024xf32> -> vector<8x1024xf32>
    %c0_12 = arith.constant 0 : index
    %c0_13 = arith.constant 0 : index
    %21 = vector.load %arg5[%c0_12, %c0_13] : memref<8x1024xf32, #tpu.memory_space<vmem>>, vector<8x1024xf32>
    tpu.vector_store %arg5[%c0_12, %c0_13], %20 {strides = array<i32>} : memref<8x1024xf32, #tpu.memory_space<vmem>>, vector<8x1024xf32>,
    return
  }
  func.func @transform_0(%arg0: i32) -> (i32, i32) {
    %c0_i32 = arith.constant 0 : i32
    %c0_i32_0 = arith.constant 0 : i32
    %c0_i32_1 = arith.constant 0 : i32
    return %c0_i32, %c0_i32_0 : i32, i32
  }
  func.func @transform_1(%arg0: i32) -> (i32, i32) {
    %c0_i32 = arith.constant 0 : i32
    %c0_i32_0 = arith.constant 0 : i32
    %c0_i32_1 = arith.constant 0 : i32
    return %c0_i32, %c0_i32_0 : i32, i32
  }
  func.func @transform_2(%arg0: i32) -> (i32, i32) {
    %c0_i32 = arith.constant 0 : i32
    %c0_i32_0 = arith.constant 0 : i32
    %c0_i32_1 = arith.constant 0 : i32
    return %c0_i32, %c0_i32_0 : i32, i32
  }
  func.func @transform_3(%arg0: i32) -> (i32, i32) {
    %c0_i32 = arith.constant 0 : i32
    %c0_i32_0 = arith.constant 0 : i32
    %c0_i32_1 = arith.constant 0 : i32
    return %c0_i32, %c0_i32_0 : i32, i32
  }
  func.func @transform_4(%arg0: i32) -> (i32, i32) {
    %c0_i32 = arith.constant 0 : i32
    %c0_i32_0 = arith.constant 0 : i32
    %c0_i32_1 = arith.constant 0 : i32
    return %c0_i32, %c0_i32_0 : i32, i32
  }
}

</mosaic_0001>

<bundles_post_ra>
// kernel: tpu_custom_call.1
= control target key start
LH: loop header
LB: loop body
LE: loop exit
PB: predicated region body
PF: predicated region fallthrough
CT: control target
= control target key end

     0   :  { %9 = vsyncpa [#allocation3], 0  ;;  %s3162_s0 = inlined_call_operand.vmem [shape: f32[1,16], index: 0, kind: input, shape index: {}]   ;;  %s3163_s1 = inlined_call_operand.vmem [shape: f32[32,2], index: 1, kind: input, shape index: {}]   ;;  %s3164_s2 = inlined_call_operand.vmem [shape: f32[8,32], index: 2, kind: input, shape index: {}]   ;;  %s3165_s3 = inlined_call_operand.hbm [shape: f32[16,1024], index: 3, kind: input, shape index: {}]   ;;  %s3166_s4 = inlined_call_operand.hbm [shape: f32[8,1024], index: 4, kind: output, shape index: {}]  }
   0x1   :  { %10 = vsyncpa [#allocation4], 0  ;;  %s2941_s15 = smov [#allocation2]   ;;  %s2893_s19 = scalar_lea.hbm %s3165_s3, 2048 }
   0x2   :  { %s22_s16 = sshll.u32 %s2941_s15, 4  ;;  %p2894_p0 = scmp.ne.s32.totalorder %s3165_s3, %s2893_s19  ;;  %s23_s16 = int_to_ptr.vmem [resolvable:$true] %s22_s16 }
   0x3   :  { %p2897_p1 = scmp.lt.u32.totalorder %s2893_s19, %s3165_s3 }
   0x5   :  { %p2899_p2 = pnand %p2897_p1, %p2894_p0 }
   0x7   :  { %2902 = shalt.err (!%p2899_p2)
}
   0x8   :  { %s2903_s24 = scalar_lea.vmem %s23_s16, 2048  ;;  %p2908_p4 = scmp.lt.s32.totalorder %s23_s16, %s23_s16 }
   0x9   :  { %p2904_p3 = scmp.ne.s32.totalorder %s23_s16, %s2903_s24  ;;  %p2909_p5 = scmp.lt.s32.totalorder %s2903_s24, %s2903_s24 }
   0xb   :  { %p2910_p6 = por %p2909_p5, %p2908_p4 }
   0xd   :  { %p2911_p7 = pnand %p2910_p6, %p2904_p3 }
   0xf   :  { %2914 = shalt.err (!%p2911_p7)
}
  0x10   :  { %s2942_s25 = smov 1024   ;;  %s2943_s26 = smov 64  }
  0x11   :  { %28 = dma.hbm_to_vmem [thread:$0]  %s3165_s3, 2048, %s23_s16, [#allocation3], %s2942_s25, %s2942_s25, %s2943_s26  }
  0x12   :  { %2937 = dma.done.wait [#allocation3], 2048  }
  0x13   :  { %2938 = vsyncadd [#allocation3], 4294965248  ;;  %v2944_v0 = vmov 1   ;;  %v2945_v1 = vmov 0   ;;  %v32_v2 = vld [vmem:[%s3163_s1] sm:$0xff]  ;;  %v33_v3 = vld [vmem:[%s3163_s1 + $0x8] sm:$0xff] }
  0x14   :  { %2885 = vset.pattern.permute.xlu1 %v2944_v0  ;;  %2884 = vset.pattern.permute.xlu0 %v2945_v1  ;;  %v34_v4 = vld [vmem:[%s3163_s1 + $0x10] sm:$0xff]  ;;  %v35_v5 = vld [vmem:[%s3163_s1 + $0x18] sm:$0xff]  ;;  %v2946_v6 = vmov 0.0|0.0   ;;  %vm2947_vm0 = vmmov 0   ;;  %v2948_v7 = vmov 0.0   ;;  %v91_v11 = vld [vmem:[%s3164_s2] sm:$0xff] }
  0x15   :  { %68 = vperm.xlu1 %2885, %v32_v2   ;;  %39 = vperm.xlu0 %2884, %v32_v2   ;;  %v2595_v8 = vld [vmem:[%s3162_s0] ss:$0 sm:$0xff]  ;;  %vm92_vm1 = vcmask 261120   ;;  %v593_v2 = vld [vmem:[#allocation2 + $0x28] sm:$0xff]  ;;  %vm604_vm2 = vcmask 130048   ;;  %s2949_s0 = smov [#allocation5]  }
  0x16   :  { %2693 = vmatprep.subr.bf16.mxu0 %v2946_v6  ;;  %2635 = vmatprep.mubr.msk.f32.mxu0 %vm2947_vm0, %v2948_v7  ;;  %v94_v14 = vsel %vm92_vm1, %v91_v11, 0  ;;  %s2586_s2 = sshll.u32 %s2949_s0, 4  ;;  %s2587_s2 = int_to_ptr.vmem [resolvable:$true] %s2586_s2 }
  0x17   :  { %676 = vmatprep.mubr.f32.mxu1 %v2948_v7  ;;  %v3009_v19 = vand.u32 4294901760, %v94_v14  ;;  %s2915_s13 = scalar_lea.vmem %s2587_s2, 1024  ;;  %p2920_p9 = scmp.lt.s32.totalorder %s2587_s2, %s2587_s2 }
  0x18   :  { %p2916_p8 = scmp.ne.s32.totalorder %s2587_s2, %s2915_s13  ;;  %p2921_p10 = scmp.lt.s32.totalorder %s2915_s13, %s2915_s13 }
  0x19   :  { %72 = vperm.xlu1 %2885, %v33_v3   ;;  %44 = vperm.xlu0 %2884, %v33_v3   ;;  %v166_v25 = vsub.f32 %v94_v14, %v3009_v19  ;;  %v592_v14 = vld [vmem:[#allocation2 + $0x20] sm:$0xff] }
  0x1a   :  { %p2922_p11 = por %p2921_p10, %p2920_p9 }
  0x1b   :  { %v167_v35 = vand.u32 4294901760, %v166_v25 }
  0x1c   :  { %p2923_p12 = pnand %p2922_p11, %p2916_p8 }
  0x1d   :  { %2886 = vset.pattern.permute.xlu1 %v2945_v1  ;;  %49 = vperm.xlu0 %2884, %v34_v4   ;;  %v168_v43 = vsub.f32 %v166_v25, %v167_v35  ;;  %v597_v1 = vld [vmem:[#allocation2 + $0x48] sm:$0xff] }
  0x1e   :  { %54 = vperm.xlu1 %2886, %v35_v5  }
  0x1f   :  { %v169_v51 = vand.u32 4294901760, %v168_v43 }
  0x21   :  { %2887 = vset.pattern.permute.xlu0 %v2944_v0 }
  0x22   :  { %2888 = vset.pattern.permute.xlu1 %v2944_v0  ;;  %76 = vperm.xlu0 %2887, %v34_v4   ;;  %v589_v0 = vld [vmem:[#allocation2 + $0x8] sm:$0xff]  ;;  %v612_v4 = vand.u32 4294901760, %v597_v1 }
  0x23   :  { %80 = vperm.xlu1 %2888, %v35_v5   ;;  %v608_v3 = vand.u32 4294901760, %v589_v0  ;;  %v601_v5 = vld [vmem:[#allocation2 + $0x68] sm:$0xff] }
  0x24   :  { %v1594_v11 = vand.u32 4294901760, %v601_v5 }
  0x94   :  { %v69_v9 = vpop.permute.xlu1 %68  ;;  %v40_v10 = vpop.permute.xlu0 %39 }
  0x95   :  { %v63_v12 = vmul.f32 %v2595_v8, %v40_v10  ;;  %v596_v10 = vld [vmem:[#allocation2 + $0x40] sm:$0xff] }
  0x97   :  { %v83_v13 = vadd.f32 %v69_v9, %v63_v12  ;;  %v588_v9 = vld [vmem:[#allocation2] sm:$0xff] }
  0x98   :  { %v73_v15 = vpop.permute.xlu1 %72  ;;  %v45_v16 = vpop.permute.xlu0 %44  ;;  %v610_v12 = vand.u32 4294901760, %v588_v9 }
  0x99   :  { %v87_v17 = vmax.f32 %v83_v13, 0.0  ;;  %v64_v18 = vmul.f32 %v2595_v8, %v45_v16  ;;  %v614_v13 = vand.u32 4294901760, %v596_v10  ;;  %v3039_v16 = vsub.f32 %v589_v0, %v608_v3 }
  0x9b   :  { %v97_v20 = vand.u32 4294901760, %v87_v17  ;;  %v84_v21 = vadd.f32 %v73_v15, %v64_v18  ;;  %v600_v15 = vld [vmem:[#allocation2 + $0x60] sm:$0xff] }
  0x9c   :  { %v50_v22 = vpop.permute.xlu0 %49 }
  0x9d   :  { %v88_v23 = vmax.f32 %v84_v21, 0.0  ;;  %v55_v24 = vpop.permute.xlu1 %54  ;;  %v177_v26 = vsub.f32 %v87_v17, %v97_v20  ;;  %v65_v28 = vmul.f32 %v2595_v8, %v50_v22  ;;  %v3041_v17 = vsub.f32 %v597_v1, %v612_v4 }
  0x9e   :  { %v66_v30 = vmul.f32 %v2595_v8, %v55_v24  ;;  %v1590_v8 = vand.u32 4294901760, %v593_v2  ;;  %v3049_v21 = vpack.c.bf16 %v614_v13, %v610_v12  ;;  %v3051_v22 = vsub.f32 %v588_v9, %v610_v12 }
  0x9f   :  { %v100_v27 = vand.u32 4294901760, %v88_v23  ;;  %v178_v36 = vand.u32 4294901760, %v177_v26  ;;  %v1592_v24 = vand.u32 4294901760, %v592_v14 }
  0xa0   :  { %v3043_v18 = vsub.f32 %v593_v2, %v1590_v8 }
  0xa1   :  { %v184_v29 = vsub.f32 %v88_v23, %v100_v27  ;;  %v77_v31 = vpop.permute.xlu0 %76  ;;  %v2694_v32 = vpack.c.bf16 %v100_v27, %v97_v20  ;;  %v179_v44 = vsub.f32 %v177_v26, %v178_v36  ;;  %v3047_v20 = vsub.f32 %v601_v5, %v1594_v11 }
  0xa2   :  { %v85_v33 = vadd.f32 %v77_v31, %v65_v28  ;;  %v81_v34 = vpop.permute.xlu1 %80  ;;  %v3054_v23 = vsub.f32 %v596_v10, %v614_v13  ;;  %v702_v27 = vand.u32 4294901760, %v3041_v17  ;;  %v696_v28 = vand.u32 4294901760, %v3051_v22 }
  0xa3   :  { %v185_v37 = vand.u32 4294901760, %v184_v29  ;;  %v86_v38 = vadd.f32 %v81_v34, %v66_v30  ;;  %2695 = vmatpush3.bf16.msra.mxu0 %v2694_v32  ;;  %v180_v53 = vand.u32 4294901760, %v179_v44  ;;  %v2706_v60 = vpack.c.bf16 %v184_v29, %v177_v26 }
  0xa4   :  { %v89_v39 = vmax.f32 %v85_v33, 0.0  ;;  %2696 = vmatprep.subr.bf16.mxu0 %v2946_v6  ;;  %v690_v26 = vand.u32 4294901760, %v3039_v16  ;;  %v1684_v30 = vand.u32 4294901760, %v3047_v20 }
  0xa5   :  { %v186_v40 = vsub.f32 %v184_v29, %v185_v37  ;;  %v90_v41 = vmax.f32 %v86_v38, 0.0  ;;  %v2718_v62 = vpack.c.bf16 %v185_v37, %v178_v36  ;;  %v1672_v29 = vand.u32 4294901760, %v3043_v18 }
  0xa6   :  { %v103_v42 = vand.u32 4294901760, %v89_v39  ;;  %v691_v34 = vsub.f32 %v3039_v16, %v690_v26  ;;  %v697_v36 = vsub.f32 %v3051_v22, %v696_v28  ;;  %v708_v37 = vand.u32 4294901760, %v3054_v23 }
  0xa7   :  { %v106_v45 = vand.u32 4294901760, %v90_v41  ;;  %v187_v49 = vand.u32 4294901760, %v186_v40  ;;  %v1673_v38 = vsub.f32 %v3043_v18, %v1672_v29  ;;  %v1685_v40 = vsub.f32 %v3047_v20, %v1684_v30 }
  0xa8   :  { %v191_v46 = vsub.f32 %v89_v39, %v103_v42  ;;  %v692_v39 = vand.u32 4294901760, %v691_v34  ;;  %v698_v44 = vand.u32 4294901760, %v697_v36 }
  0xa9   :  { %v198_v47 = vsub.f32 %v90_v41, %v106_v45  ;;  %v2697_v48 = vpack.c.bf16 %v106_v45, %v103_v42  ;;  %v2700_v56 = vpack.c.bf16 %v187_v49, %v180_v53  ;;  %v709_v45 = vsub.f32 %v3054_v23, %v708_v37 }
  0xaa   :  { %v192_v50 = vand.u32 4294901760, %v191_v46 }
  0xab   :  { %v199_v52 = vand.u32 4294901760, %v198_v47  ;;  %2698 = vmatpush3.bf16.msra.mxu0 %v2697_v48  ;;  %v2709_v61 = vpack.c.bf16 %v198_v47, %v191_v46 }
  0xac   :  { %v193_v54 = vsub.f32 %v191_v46, %v192_v50  ;;  %2699 = vmatprep.subr.bf16.mxu0 %v2946_v6  ;;  %v1674_v46 = vand.u32 4294901760, %v1673_v38 }
  0xad   :  { %v200_v55 = vsub.f32 %v198_v47, %v199_v52  ;;  %v2721_v63 = vpack.c.bf16 %v199_v52, %v192_v50  ;;  %v1686_v47 = vand.u32 4294901760, %v1685_v40 }
  0xae   :  { %v194_v57 = vand.u32 4294901760, %v193_v54  ;;  %2636 = vmatmul.mubr.f32.vlgmr.msra.gmra.mrb[0].mxu0 %v169_v51  ;;  %v710_v51 = vand.u32 4294901760, %v709_v45 }
  0xaf   :  { %v201_v58 = vand.u32 4294901760, %v200_v55  ;;  %2701 = vmatpush3.bf16.msra.mxu0 %v2700_v56  ;;  %2646 = vmatprep.mubr.msk.f32.mxu0 %vm2947_vm0, %v2948_v7  ;;  %v2781_v52 = vpack.c.bf16 %v1686_v47, %v1674_v46  ;;  %v595_v46 = vld [vmem:[#allocation2 + $0x38] sm:$0xff] }
  0xb0   :  { %2702 = vmatprep.subr.bf16.mxu0 %v2946_v6  ;;  %v2735_v55 = vpack.c.bf16 %v710_v51, %v698_v44  ;;  %v603_v47 = vld [vmem:[#allocation2 + $0x78] sm:$0xff]  ;;  %v602_v51 = vld [vmem:[#allocation2 + $0x70] sm:$0xff] }
  0xb1   :  { %v2703_v59 = vpack.c.bf16 %v201_v58, %v194_v57  ;;  %v2737_v57 = vpack.c.bf16 %v3041_v17, %v3039_v16  ;;  %v2739_v58 = vpack.c.bf16 %v3054_v23, %v3051_v22  ;;  %v591_v16 = vld [vmem:[#allocation2 + $0x18] sm:$0xff]  ;;  %v590_v22 = vld [vmem:[#allocation2 + $0x10] sm:$0xff] }
  0xb2   :  { %v598_v23 = vld [vmem:[#allocation2 + $0x50] sm:$0xff] }
  0xb3   :  { %2704 = vmatpush3.bf16.msra.mxu0 %v2703_v59  ;;  %v2785_v59 = vpack.c.bf16 %v3047_v20, %v3043_v18  ;;  %v1099_v18 = vand.u32 4294901760, %v591_v16 }
  0xb4   :  { %2705 = vmatprep.subr.bf16.mxu0 %v2946_v6 }
  0xb6   :  { %2647 = vmatmul.mubr.f32.vlgmr.msra.gmra.mrb[0].mxu0 %v3009_v19 }
  0xb7   :  { %2707 = vmatpush3.bf16.msra.mxu0 %v2706_v60  ;;  %2657 = vmatprep.mubr.msk.f32.mxu0 %vm2947_vm0, %v2948_v7 }
  0xb8   :  { %2708 = vmatprep.subr.bf16.mxu0 %v2946_v6 }
  0xbb   :  { %2710 = vmatpush3.bf16.msra.mxu0 %v2709_v61  ;;  %v2745_v61 = vpack.c.bf16 %v702_v27, %v690_v26  ;;  %v1180_v26 = vsub.f32 %v591_v16, %v1099_v18 }
  0xbc   :  { %2711 = vmatprep.subr.bf16.mxu0 %v2946_v6 }
  0xbe   :  { %2658 = vmatmul.mubr.f32.vlgmr.msra.gmra.mrb[0].mxu0 %v166_v25  ;;  %v1596_v25 = vand.u32 4294901760, %v600_v15 }
  0xbf   :  { %2713 = vmatpush3.bf16.msra.mxu0 %v2694_v32  ;;  %2668 = vmatprep.mubr.msk.f32.mxu0 %vm2947_vm0, %v2948_v7 }
  0xc0   :  { %2714 = vmatprep.subr.bf16.mxu0 %v2946_v6  ;;  %v3063_v31 = vpack.c.bf16 %v1596_v25, %v1592_v24  ;;  %v1689_v33 = vsub.f32 %v600_v15, %v1596_v25  ;;  %v1105_v25 = vand.u32 4294901760, %v598_v23 }
  0xc2   :  { %v1690_v42 = vand.u32 4294901760, %v1689_v33 }
  0xc3   :  { %2716 = vmatpush3.bf16.msra.mxu0 %v2697_v48 }
  0xc4   :  { %2717 = vmatprep.subr.bf16.mxu0 %v2946_v6  ;;  %v1691_v49 = vsub.f32 %v1689_v33, %v1690_v42 }
  0xc6   :  { %2669 = vmatmul.mubr.f32.vlgmr.msra.gmra.mrb[0].mxu0 %v167_v35  ;;  %v703_v35 = vsub.f32 %v3041_v17, %v702_v27  ;;  %v1692_v54 = vand.u32 4294901760, %v1691_v49  ;;  %v599_v17 = vld [vmem:[#allocation2 + $0x58] sm:$0xff]  ;;  %v2085_v49 = vand.u32 4294901760, %v603_v47 }
  0xc7   :  { %2719 = vmatpush3.bf16.msra.mxu0 %v2718_v62  ;;  %2679 = vmatprep.mubr.msk.f32.mxu0 %vm2947_vm0, %v2948_v7  ;;  %v2747_v62 = vpack.c.bf16 %v708_v37, %v696_v28  ;;  %v1103_v20 = vand.u32 4294901760, %v599_v17 }
  0xc8   :  { %2720 = vmatprep.subr.bf16.mxu0 %v2946_v6  ;;  %v704_v43 = vand.u32 4294901760, %v703_v35 }
  0xc9   :  { %v1192_v27 = vsub.f32 %v599_v17, %v1103_v20  ;;  %v2753_v37 = vpack.c.bf16 %v1103_v20, %v1099_v18 }
  0xca   :  { %v2733_v50 = vpack.c.bf16 %v704_v43, %v692_v39 }
  0xcb   :  { %2722 = vmatpush3.bf16.msra.mxu0 %v2721_v63  ;;  %v2793_v63 = vpack.c.bf16 %v1684_v30, %v1672_v29  ;;  %v1198_v29 = vsub.f32 %v598_v23, %v1105_v25  ;;  %v1181_v30 = vand.u32 4294901760, %v1180_v26 }
  0xcc   :  { %2723 = vmatprep.subr.bf16.mxu0 %v2946_v6 }
  0xcd   :  { %v1199_v34 = vand.u32 4294901760, %v1198_v29  ;;  %v1182_v35 = vsub.f32 %v1180_v26, %v1181_v30 }
  0xce   :  { %2680 = vmatmul.mubr.f32.vlgmr.msra.gmra.mrb[0].mxu0 %v3009_v19 }
  0xcf   :  { %2725 = vmatpush3.bf16.msra.mxu0 %v2694_v32  ;;  %2690 = vmatprep.mubr.msk.f32.mxu0 %vm2947_vm0, %v2948_v7  ;;  %v3065_v32 = vsub.f32 %v592_v14, %v1592_v24  ;;  %v1101_v24 = vand.u32 4294901760, %v590_v22  ;;  %v1200_v39 = vsub.f32 %v1198_v29, %v1199_v34 }
  0xd0   :  { %2726 = vmatprep.subr.bf16.mxu0 %v2946_v6  ;;  %v3037_v6 = vpack.c.bf16 %v612_v4, %v608_v3 }
  0xd1   :  { %v1678_v41 = vand.u32 4294901760, %v3065_v32  ;;  %v2787_v60 = vpack.c.bf16 %v1689_v33, %v3065_v32  ;;  %v1186_v28 = vsub.f32 %v590_v22, %v1101_v24  ;;  %v2755_v40 = vpack.c.bf16 %v1105_v25, %v1101_v24 }
  0xd2   :  { %2730 = vmatprep.subr.bf16.mxu1 %v3037_v6 }
  0xd3   :  { %2728 = vmatpush3.bf16.msra.mxu0 %v2697_v48  ;;  %2732 = vmatpush1.bf16.msra.mxu1 %v3049_v21  ;;  %v1679_v48 = vsub.f32 %v3065_v32, %v1678_v41  ;;  %v2795_v0 = vpack.c.bf16 %v1690_v42, %v1678_v41  ;;  %v1193_v32 = vand.u32 4294901760, %v1192_v27  ;;  %v1187_v33 = vand.u32 4294901760, %v1186_v28 }
  0xd4   :  { %2734 = vmatprep.subr.bf16.mxu1 %v2733_v50  ;;  %v1201_v42 = vand.u32 4294901760, %v1200_v39  ;;  %v2763_v44 = vpack.c.bf16 %v1198_v29, %v1186_v28  ;;  %v594_v50 = vld [vmem:[#allocation2 + $0x30] sm:$0xff] }
  0xd5   :  { %v1680_v53 = vand.u32 4294901760, %v1679_v48  ;;  %v1194_v36 = vsub.f32 %v1192_v27, %v1193_v32  ;;  %v1188_v38 = vsub.f32 %v1186_v28, %v1187_v33  ;;  %v2769_v45 = vpack.c.bf16 %v1193_v32, %v1181_v30 }
  0xd6   :  { %2691 = vmatmul.mubr.f32.vlgmr.msra.gmra.mrb[0].mxu0 %v3009_v19  ;;  %v3045_v19 = vpack.c.bf16 %v1594_v11, %v1590_v8  ;;  %v2081_v48 = vand.u32 4294901760, %v595_v46 }
  0xd7   :  { %1658 = vmatprep.mubr.f32.mxu0 %v2948_v7  ;;  %v2783_v56 = vpack.c.bf16 %v1692_v54, %v1680_v53  ;;  %v1189_v41 = vand.u32 4294901760, %v1188_v38  ;;  %v2083_v53 = vand.u32 4294901760, %v594_v50  ;;  %v2087_v54 = vand.u32 4294901760, %v602_v51 }
  0xd8   :  { %2778 = vmatprep.subr.bf16.mxu0 %v3045_v19 }
  0xd9   :  { %2780 = vmatpush1.bf16.msra.mxu0 %v3063_v31 }
  0xda   :  { %2782 = vmatprep.subr.bf16.mxu0 %v2781_v52  ;;  %v2771_v52 = vpack.c.bf16 %v1199_v34, %v1187_v33 }
 0x1a9   :  { %v577_v1 = vpop.f32.mrb[0].mxu0 }
 0x1aa   :  { %v2596_v2 = vmul.f32 -1.442695, %v577_v1  ;;  %v2692_v3 = vpop.f32.mrb[1].mxu0 }
 0x1ac   :  { %2889 = vpow2.f32 %v2596_v2 }
 0x1b6   :  { %v2890_v4 = vpop.eup %2889 }
 0x1b7   :  { %v584_v5 = vadd.f32 1.0, %v2890_v4 }
 0x1b9   :  { %2891 = vrcp.f32 %v584_v5 }
 0x1c3   :  { %v2892_v8 = vpop.eup %2891 }
 0x1c4   :  { %v587_v9 = vmul.f32 16.0, %v2892_v8  ;;  %v2803_v8 = vpack.c.bf16 %v2087_v54, %v2083_v53 }
 0x1c6   :  { %v606_v10 = vsel %vm604_vm2, %v587_v9, 0 }
 0x1c7   :  { %v3084_v11 = vand.u32 4294901760, %v606_v10 }
 0x1c9   :  { %v3087_v12 = vsub.f32 %v606_v10, %v3084_v11 }
 0x1cb   :  { %v3090_v13 = vand.u32 4294901760, %v3087_v12 }
 0x1cd   :  { %v680_v14 = vsub.f32 %v3087_v12, %v3090_v13 }
 0x1cf   :  { %v3094_v15 = vand.u32 4294901760, %v680_v14 }
 0x1d1   :  { %682 = vmatmul.mubr.f32.vlgmr.msra.gmra.mrb[0].mxu1 %v3094_v15  ;;  %1664 = vmatmul.mubr.f32.vlgmr.msra.gmra.mrb[2].mxu0 %v3094_v15 }
 0x1d2   :  { %2736 = vmatpush1.bf16.msra.mxu1 %v2735_v55  ;;  %2784 = vmatpush1.bf16.msra.mxu0 %v2783_v56  ;;  %v2162_v55 = vsub.f32 %v595_v46, %v2081_v48  ;;  %v2174_v56 = vsub.f32 %v603_v47, %v2085_v49 }
 0x1d3   :  { %772 = vmatprep.mubr.f32.mxu1 %v2948_v7  ;;  %1754 = vmatprep.mubr.f32.mxu0 %v2948_v7 }
 0x1d4   :  { %2738 = vmatprep.subr.bf16.mxu1 %v2737_v57  ;;  %2786 = vmatprep.subr.bf16.mxu0 %v2785_v59  ;;  %v2168_v57 = vsub.f32 %v594_v50, %v2083_v53  ;;  %v2163_v59 = vand.u32 4294901760, %v2162_v55  ;;  %v2809_v17 = vpack.c.bf16 %v2174_v56, %v2162_v55 }
 0x1d9   :  { %774 = vmatmul.mubr.f32.vlgmr.msra.gmra.mrb[0].mxu1 %v3084_v11  ;;  %1756 = vmatmul.mubr.f32.vlgmr.msra.gmra.mrb[2].mxu0 %v3084_v11 }
 0x1da   :  { %2740 = vmatpush1.bf16.msra.mxu1 %v2739_v58  ;;  %2788 = vmatpush1.bf16.msra.mxu0 %v2787_v60  ;;  %v2180_v58 = vsub.f32 %v602_v51, %v2087_v54  ;;  %v2175_v60 = vand.u32 4294901760, %v2174_v56 }
 0x1db   :  { %852 = vmatprep.mubr.f32.mxu1 %v2948_v7  ;;  %1834 = vmatprep.mubr.f32.mxu0 %v2948_v7 }
 0x1dc   :  { %2742 = vmatprep.subr.bf16.mxu1 %v3037_v6  ;;  %2790 = vmatprep.subr.bf16.mxu0 %v3045_v19  ;;  %v2176_v1 = vsub.f32 %v2174_v56, %v2175_v60  ;;  %v2811_v18 = vpack.c.bf16 %v2180_v58, %v2168_v57  ;;  %v2817_v20 = vpack.c.bf16 %v2175_v60, %v2163_v59 }
 0x1de   :  { %v2177_v5 = vand.u32 4294901760, %v2176_v1 }
 0x1e1   :  { %855 = vmatmul.mubr.f32.vlgmr.msra.gmra.mrb[0].mxu1 %v3087_v12  ;;  %1837 = vmatmul.mubr.f32.vlgmr.msra.gmra.mrb[2].mxu0 %v3087_v12 }
 0x1e2   :  { %2744 = vmatpush1.bf16.msra.mxu1 %v3049_v21  ;;  %2792 = vmatpush1.bf16.msra.mxu0 %v3063_v31 }
 0x1e3   :  { %929 = vmatprep.mubr.f32.mxu1 %v2948_v7  ;;  %1911 = vmatprep.mubr.f32.mxu0 %v2948_v7 }
 0x1e4   :  { %2746 = vmatprep.subr.bf16.mxu1 %v2745_v61  ;;  %2794 = vmatprep.subr.bf16.mxu0 %v2793_v63  ;;  %v2169_v61 = vand.u32 4294901760, %v2168_v57  ;;  %v2801_v63 = vpack.c.bf16 %v2085_v49, %v2081_v48 }
 0x1e6   :  { %v2170_v2 = vsub.f32 %v2168_v57, %v2169_v61 }
 0x1e8   :  { %v2171_v9 = vand.u32 4294901760, %v2170_v2 }
 0x1e9   :  { %933 = vmatmul.mubr.f32.vlgmr.msra.gmra.mrb[0].mxu1 %v3090_v13  ;;  %1915 = vmatmul.mubr.f32.vlgmr.msra.gmra.mrb[2].mxu0 %v3090_v13 }
 0x1ea   :  { %2748 = vmatpush1.bf16.msra.mxu1 %v2747_v62  ;;  %2796 = vmatpush1.bf16.msra.mxu0 %v2795_v0  ;;  %v2181_v62 = vand.u32 4294901760, %v2180_v58  ;;  %v2164_v0 = vsub.f32 %v2162_v55, %v2163_v59 }
 0x1eb   :  { %1015 = vmatprep.mubr.f32.mxu1 %v2948_v7  ;;  %1997 = vmatprep.mubr.f32.mxu0 %v2948_v7 }
 0x1ec   :  { %2750 = vmatprep.subr.bf16.mxu1 %v3037_v6  ;;  %2798 = vmatprep.subr.bf16.mxu0 %v3045_v19  ;;  %v1183_v6 = vand.u32 4294901760, %v1182_v35  ;;  %v1195_v19 = vand.u32 4294901760, %v1194_v36  ;;  %v2182_v3 = vsub.f32 %v2180_v58, %v2181_v62  ;;  %v2165_v4 = vand.u32 4294901760, %v2164_v0 }
 0x1ed   :  { %v2819_v22 = vpack.c.bf16 %v2181_v62, %v2169_v61 }
 0x1ee   :  { %v2757_v43 = vpack.c.bf16 %v1195_v19, %v1183_v6  ;;  %v2183_v10 = vand.u32 4294901760, %v2182_v3  ;;  %v2805_v14 = vpack.c.bf16 %v2177_v5, %v2165_v4 }
 0x1f0   :  { %v2807_v16 = vpack.c.bf16 %v2183_v10, %v2171_v9 }
 0x1f1   :  { %1017 = vmatmul.mubr.f32.vlgmr.msra.gmra.mrb[0].mxu1 %v3084_v11  ;;  %1999 = vmatmul.mubr.f32.vlgmr.msra.gmra.mrb[2].mxu0 %v3084_v11 }
 0x1f2   :  { %2752 = vmatpush1.bf16.msra.mxu1 %v3049_v21  ;;  %2800 = vmatpush1.bf16.msra.mxu0 %v3063_v31  ;;  %v2759_v21 = vpack.c.bf16 %v1201_v42, %v1189_v41  ;;  %v2761_v31 = vpack.c.bf16 %v1192_v27, %v1180_v26 }
 0x1f3   :  { %1091 = vmatprep.mubr.f32.mxu1 %v2948_v7  ;;  %2073 = vmatprep.mubr.f32.mxu0 %v2948_v7 }
 0x1f4   :  { %2754 = vmatprep.subr.bf16.mxu1 %v2753_v37 }
 0x1f9   :  { %1093 = vmatmul.mubr.f32.vlgmr.msra.gmra.mrb[0].mxu1 %v3084_v11  ;;  %2075 = vmatmul.mubr.f32.vlgmr.msra.gmra.mrb[2].mxu0 %v3084_v11 }
 0x1fa   :  { %2756 = vmatpush1.bf16.msra.mxu1 %v2755_v40  ;;  %1167 = vmatprep.mubr.f32.mxu1 %v2948_v7 }
 0x1fb   :  { %2758 = vmatprep.subr.bf16.mxu1 %v2757_v43 }
 0x1fd   :  { %1173 = vmatmul.mubr.f32.vlgmr.msra.gmra.mrb[2].mxu1 %v3094_v15 }
 0x1fe   :  { %2760 = vmatpush1.bf16.msra.mxu1 %v2759_v21  ;;  %1263 = vmatprep.mubr.f32.mxu1 %v2948_v7 }
 0x1ff   :  { %2762 = vmatprep.subr.bf16.mxu1 %v2761_v31 }
 0x205   :  { %1265 = vmatmul.mubr.f32.vlgmr.msra.gmra.mrb[2].mxu1 %v3084_v11 }
 0x206   :  { %2764 = vmatpush1.bf16.msra.mxu1 %v2763_v44  ;;  %1343 = vmatprep.mubr.f32.mxu1 %v2948_v7 }
 0x207   :  { %2766 = vmatprep.subr.bf16.mxu1 %v2753_v37 }
 0x20d   :  { %1346 = vmatmul.mubr.f32.vlgmr.msra.gmra.mrb[2].mxu1 %v3087_v12 }
 0x20e   :  { %2768 = vmatpush1.bf16.msra.mxu1 %v2755_v40  ;;  %1420 = vmatprep.mubr.f32.mxu1 %v2948_v7 }
 0x20f   :  { %2770 = vmatprep.subr.bf16.mxu1 %v2769_v45 }
 0x215   :  { %1424 = vmatmul.mubr.f32.vlgmr.msra.gmra.mrb[2].mxu1 %v3090_v13 }
 0x216   :  { %2772 = vmatpush1.bf16.msra.mxu1 %v2771_v52  ;;  %1506 = vmatprep.mubr.f32.mxu1 %v2948_v7 }
 0x217   :  { %2774 = vmatprep.subr.bf16.mxu1 %v2753_v37 }
 0x21d   :  { %1508 = vmatmul.mubr.f32.vlgmr.msra.gmra.mrb[2].mxu1 %v3084_v11 }
 0x21e   :  { %2776 = vmatpush1.bf16.msra.mxu1 %v2755_v40  ;;  %1582 = vmatprep.mubr.f32.mxu1 %v2948_v7 }
 0x21f   :  { %2802 = vmatprep.subr.bf16.mxu1 %v2801_v63 }
 0x225   :  { %1584 = vmatmul.mubr.f32.vlgmr.msra.gmra.mrb[2].mxu1 %v3084_v11 }
 0x226   :  { %2804 = vmatpush1.bf16.msra.mxu1 %v2803_v8  ;;  %2149 = vmatprep.mubr.f32.mxu1 %v2948_v7 }
 0x227   :  { %2806 = vmatprep.subr.bf16.mxu1 %v2805_v14 }
 0x229   :  { %2155 = vmatmul.mubr.f32.vlgmr.msra.gmra.mrb[4].mxu1 %v3094_v15 }
 0x22a   :  { %2808 = vmatpush1.bf16.msra.mxu1 %v2807_v16  ;;  %2245 = vmatprep.mubr.f32.mxu1 %v2948_v7 }
 0x22b   :  { %2810 = vmatprep.subr.bf16.mxu1 %v2809_v17 }
 0x231   :  { %2247 = vmatmul.mubr.f32.vlgmr.msra.gmra.mrb[4].mxu1 %v3084_v11 }
 0x232   :  { %2812 = vmatpush1.bf16.msra.mxu1 %v2811_v18  ;;  %2325 = vmatprep.mubr.f32.mxu1 %v2948_v7 }
 0x233   :  { %2814 = vmatprep.subr.bf16.mxu1 %v2801_v63 }
 0x239   :  { %2328 = vmatmul.mubr.f32.vlgmr.msra.gmra.mrb[4].mxu1 %v3087_v12 }
 0x23a   :  { %2816 = vmatpush1.bf16.msra.mxu1 %v2803_v8  ;;  %2402 = vmatprep.mubr.f32.mxu1 %v2948_v7 }
 0x23b   :  { %2818 = vmatprep.subr.bf16.mxu1 %v2817_v20 }
 0x241   :  { %2406 = vmatmul.mubr.f32.vlgmr.msra.gmra.mrb[4].mxu1 %v3090_v13 }
 0x242   :  { %2820 = vmatpush1.bf16.msra.mxu1 %v2819_v22  ;;  %2488 = vmatprep.mubr.f32.mxu1 %v2948_v7 }
 0x243   :  { %2822 = vmatprep.subr.bf16.mxu1 %v2801_v63 }
 0x249   :  { %2490 = vmatmul.mubr.f32.vlgmr.msra.gmra.mrb[4].mxu1 %v3084_v11 }
 0x24a   :  { %2824 = vmatpush1.bf16.msra.mxu1 %v2803_v8  ;;  %2564 = vmatprep.mubr.f32.mxu1 %v2948_v7 }
 0x251   :  { %2566 = vmatmul.mubr.f32.vlgmr.msra.gmra.mrb[4].mxu1 %v3084_v11 }
 0x2cc   :  { %v1094_v15 = vpop.f32.mrb[0].mxu1  ;;  %v2076_v12 = vpop.f32.mrb[2].mxu0 }
 0x2cd   :  { %2572 = vst [vmem:[#allocation5] sm:$0xff] %v1094_v15  ;;  %2576 = vst [vmem:[#allocation5 + $0x20] sm:$0xff] %v2076_v12  ;;  %v1096_v23 = vpop.f32.mrb[1].mxu1  ;;  %v2078_v24 = vpop.f32.mrb[3].mxu0 }
 0x2ce   :  { %2573 = vst [vmem:[#allocation5 + $0x8] sm:$0xff] %v1096_v23  ;;  %2577 = vst [vmem:[#allocation5 + $0x28] sm:$0xff] %v2078_v24 }
 0x2f8   :  { %v1585_v13 = vpop.f32.mrb[2].mxu1 }
 0x2f9   :  { %2574 = vst [vmem:[#allocation5 + $0x10] sm:$0xff] %v1585_v13  ;;  %v1587_v25 = vpop.f32.mrb[3].mxu1 }
 0x2fa   :  { %2575 = vst [vmem:[#allocation5 + $0x18] sm:$0xff] %v1587_v25 }
 0x324   :  { %v2567_v26 = vpop.f32.mrb[4].mxu1 }
 0x325   :  { %2578 = vst [vmem:[#allocation5 + $0x30] sm:$0xff] %v2567_v26  ;;  %v2569_v7 = vpop.f32.mrb[5].mxu1 }
 0x326   :  { %2579 = vst [vmem:[#allocation5 + $0x38] sm:$0xff] %v2569_v7 }
 0x327   :  { %2926 = shalt.err (!%p2923_p12)
}
 0x328   :  { %s2927_s16 = scalar_lea.hbm %s3166_s4, 1024 }
 0x329   :  { %p2928_p13 = scmp.ne.s32.totalorder %s3166_s4, %s2927_s16  ;;  %p2931_p0 = scmp.lt.u32.totalorder %s2927_s16, %s3166_s4 }
 0x32b   :  { %p2933_p1 = pnand %p2931_p0, %p2928_p13 }
 0x32d   :  { %2936 = shalt.err (!%p2933_p1)
}
 0x32e   :  { %2589 = dma.vmem_to_hbm [thread:$0]  %s2587_s2, 1024, %s3166_s4, [#allocation4]  }
 0x32f   :  { %2939 = dma.done.wait [#allocation4], 1024  }
 0x330   :  { %2940 = vsyncadd [#allocation4], 4294966272 }
 0x331   :  { %2593 = vsyncpa [#allocation3], 1 }
 0x332   :  { %2594 = vsyncpa [#allocation4], 1 }

</bundles_post_ra>
